<compile_context>
chip_gen: v6e
topology: v6e:2x2x1
jax: 0.10.0
libtpu: 0.0.40
codegen_flags: <defaults>
</compile_context>

<pallas_src>
import functools

import jax
import jax.numpy as jnp
from jax import lax
from jax.experimental import pallas as pl
from jax.experimental.pallas import tpu as pltpu

# Finite "infinity" sentinel. A row with no positive / no negative would give
# an extreme dist_ap/dist_an, and the hinge clamps the result to 0 — same
# practical behavior as the reference (which always has the diagonal as a
# positive and errors out on "no negative").
_BIG = 3.0e38


def _triplet_kernel(xr_ref, xc_ref, sqc_ref, tr_ref, tc_ref,
                    out_ref, maxp_ref, minn_ref,
                    *, n_valid, tn, margin):
    j = pl.program_id(1)

    # ---- init running accumulators at the start of each column sweep ----
    @pl.when(j == 0)
    def _():
        maxp_ref[...] = jnp.full_like(maxp_ref, -_BIG)
        minn_ref[...] = jnp.full_like(minn_ref, _BIG)

    xr = xr_ref[...]                                    # (tm, d) row tile
    xc = xc_ref[...]                                    # (tn, d) col tile

    # Gram block on the MXU; contracting dims (1, 1) avoids materializing x.T.
    gram = lax.dot_general(
        xr, xc, dimension_numbers=(((1,), (1,)), ((), ())),
        preferred_element_type=jnp.float32)             # (tm, tn)

    # Row norms in f32 from the resident row tile (no transpose needed).
    xr32 = xr.astype(jnp.float32)
    sq_r = jnp.sum(xr32 * xr32, axis=1, keepdims=True)  # (tm, 1)

    # Squared pairwise distances for this (row, col) tile. Mining happens on
    # dist2; clamp + sqrt are monotone so max/min commute with them.
    dist2 = sq_r + sqc_ref[...] - 2.0 * gram            # (tm, tn)

    # Same-label mask: labels supplied in both orientations (no in-kernel .T).
    same = tr_ref[...] == tc_ref[...]                   # (tm, tn) bool

    # Mask out padded columns (batch padded up to a tile multiple).
    col_ids = j * tn + lax.broadcasted_iota(jnp.int32, dist2.shape, 1)
    col_ok = col_ids < n_valid

    pos = jnp.logical_and(same, col_ok)
    neg = jnp.logical_and(jnp.logical_not(same), col_ok)

    maxp_ref[...] = jnp.maximum(
        maxp_ref[...],
        jnp.max(jnp.where(pos, dist2, -_BIG), axis=1, keepdims=True))
    minn_ref[...] = jnp.minimum(
        minn_ref[...],
        jnp.min(jnp.where(neg, dist2, _BIG), axis=1, keepdims=True))

    # ---- finalize: per-sample hinge loss (mean is taken in the wrapper) ----
    @pl.when(j == pl.num_programs(1) - 1)
    def _():
        # clamp(1e-12) then sqrt matches the reference dist.clamp(1e-12).sqrt()
        d_ap = jnp.sqrt(jnp.maximum(maxp_ref[...], 1e-12))
        d_an = jnp.sqrt(jnp.maximum(minn_ref[...], 1e-12))
        out_ref[...] = jnp.maximum(d_ap - d_an + margin, 0.0)


def triplet_loss(inputs, targets, *, margin=0.3, tile=128):
    """inputs: (n, d) float features; targets: (n,) int labels -> scalar loss."""
    n, d = inputs.shape
    x = inputs
    t = targets.reshape(n).astype(jnp.int32)

    # Tile/pad the batch axis. Small batches use a single full block.
    if n <= tile:
        tm = tn = n
        n_pad = n
    else:
        tm = tn = tile
        n_pad = pl.cdiv(n, tile) * tile
        pad = n_pad - n
        if pad:
            x = jnp.pad(x, ((0, pad), (0, 0)))
            t = jnp.pad(t, ((0, pad),))

    # Column-oriented row norms (f32) and both label orientations, prepared in
    # the wrapper so the kernel never transposes lane/sublane-sparse vectors.
    x32 = x.astype(jnp.float32)
    sq_col = jnp.sum(x32 * x32, axis=1).reshape(1, n_pad)
    t_row = t.reshape(n_pad, 1)
    t_col = t.reshape(1, n_pad)

    grid = (n_pad // tm, n_pad // tn)
    kernel = functools.partial(_triplet_kernel, n_valid=n, tn=tn, margin=margin)

    per_sample = pl.pallas_call(
        kernel,
        out_shape=jax.ShapeDtypeStruct((n_pad, 1), jnp.float32),
        grid_spec=pltpu.PrefetchScalarGridSpec(
            num_scalar_prefetch=0,
            grid=grid,
            in_specs=[
                pl.BlockSpec((tm, d), lambda i, j: (i, 0)),   # x, row tile
                pl.BlockSpec((tn, d), lambda i, j: (j, 0)),   # x, col tile
                pl.BlockSpec((1, tn), lambda i, j: (0, j)),   # col norms
                pl.BlockSpec((tm, 1), lambda i, j: (i, 0)),   # row labels
                pl.BlockSpec((1, tn), lambda i, j: (0, j)),   # col labels
            ],
            out_specs=pl.BlockSpec((tm, 1), lambda i, j: (i, 0)),
            scratch_shapes=[
                pltpu.VMEM((tm, 1), jnp.float32),   # running max pos dist2
                pltpu.VMEM((tm, 1), jnp.float32),   # running min neg dist2
            ],
        ),
        compiler_params=pltpu.CompilerParams(
            dimension_semantics=("parallel", "arbitrary"),
            vmem_limit_bytes=48 * 1024 * 1024,  # headroom on all gens (<64 MiB v7x)
        ),
    )(x, x, sq_col, t_row, t_col)

    # MarginRankingLoss(margin, reduction='mean') with y=1 over real samples.
    return jnp.mean(per_sample[:n, 0])


def _reference(inputs, targets, margin=0.3):
    # Pure-JAX reference mirroring the PyTorch module.
    x = inputs.astype(jnp.float32)
    sq = jnp.sum(x * x, axis=1, keepdims=True)
    dist = jnp.sqrt(jnp.maximum(sq + sq.T - 2.0 * (x @ x.T), 1e-12))
    mask = targets[:, None] == targets[None, :]
    dist_ap = jnp.max(jnp.where(mask, dist, -jnp.inf), axis=1)
    dist_an = jnp.min(jnp.where(mask, jnp.inf, dist), axis=1)
    return jnp.mean(jnp.maximum(dist_ap - dist_an + margin, 0.0))


if __name__ == "__main__":
    key = jax.random.PRNGKey(0)
    k1, k2 = jax.random.split(key)

    # Small case: batch=8 (4 identities x 2 samples), feat_dim=32.
    n, d = 8, 32
    inputs = jax.random.normal(k1, (n, d), dtype=jnp.float32)
    targets = jnp.array([0, 0, 1, 1, 2, 2, 3, 3], dtype=jnp.int32)

    loss = triplet_loss(inputs, targets)
    jax.block_until_ready(loss)
    ref = _reference(inputs, targets)
    assert jnp.allclose(loss, ref, atol=1e-5, rtol=1e-5), (loss, ref)

    # Larger case exercising the tiled path (grid 2x2, cross-tile accumulators).
    n2, d2 = 256, 128
    inputs2 = jax.random.normal(k2, (n2, d2), dtype=jnp.float32)
    targets2 = jnp.arange(n2, dtype=jnp.int32) // 8     # 32 ids x 8 samples
    loss2 = triplet_loss(inputs2, targets2)
    jax.block_until_ready(loss2)
    ref2 = _reference(inputs2, targets2)
    assert jnp.allclose(loss2, ref2, atol=1e-4, rtol=1e-4), (loss2, ref2)

    print("KERNEL_OK")
</pallas_src>

<mosaic_0001>
module attributes {stable_mosaic.version = 11 : i64} {
  func.func @_triplet_kernel(%arg0: i32, %arg1: i32, %arg2: memref<8x32xf32, #tpu.memory_space<vmem>>, %arg3: memref<8x32xf32, #tpu.memory_space<vmem>>, %arg4: memref<1x8xf32, #tpu.memory_space<vmem>>, %arg5: memref<8x1xi32, #tpu.memory_space<vmem>>, %arg6: memref<1x8xi32, #tpu.memory_space<vmem>>, %arg7: memref<8x1xf32, #tpu.memory_space<vmem>>, %arg8: memref<8x1xf32, #tpu.memory_space<vmem>>, %arg9: memref<8x1xf32, #tpu.memory_space<vmem>>) attributes {dimension_semantics = [#tpu.dimension_semantics<parallel>, #tpu.dimension_semantics<arbitrary>], iteration_bounds = array<i64: 1, 1>, scalar_prefetch = 0 : i64, scratch_operands = 2 : i64, tpu.core_type = #tpu.core_type<tc>, window_params = [{transform_indices = @transform_0, window_bounds = array<i64: 8, 32>}, {transform_indices = @transform_1, window_bounds = array<i64: 8, 32>}, {transform_indices = @transform_2, window_bounds = array<i64: 1, 8>}, {transform_indices = @transform_3, window_bounds = array<i64: 8, 1>}, {transform_indices = @transform_4, window_bounds = array<i64: 1, 8>}, {transform_indices = @transform_5, window_bounds = array<i64: 8, 1>}]} {
    %c0_i32 = arith.constant 0 : i32
    %0 = arith.cmpi eq, %arg1, %c0_i32 : i32
    %1 = arith.extui %0 : i1 to i32
    %c0_i32_0 = arith.constant 0 : i32
    %2 = arith.cmpi ne, %1, %c0_i32_0 : i32
    scf.if %2 {
      %cst_28 = arith.constant -3.000000e+38 : f32
      %47 = vector.broadcast %cst_28 : f32 to vector<8x1xf32>
      %c0_29 = arith.constant 0 : index
      %c0_30 = arith.constant 0 : index
      %48 = vector.load %arg8[%c0_29, %c0_30] : memref<8x1xf32, #tpu.memory_space<vmem>>, vector<8x1xf32>
      tpu.vector_store %arg8[%c0_29, %c0_30], %47 {strides = array<i32>} : memref<8x1xf32, #tpu.memory_space<vmem>>, vector<8x1xf32>,
      %cst_31 = arith.constant 3.000000e+38 : f32
      %49 = vector.broadcast %cst_31 : f32 to vector<8x1xf32>
      %c0_32 = arith.constant 0 : index
      %c0_33 = arith.constant 0 : index
      %50 = vector.load %arg9[%c0_32, %c0_33] : memref<8x1xf32, #tpu.memory_space<vmem>>, vector<8x1xf32>
      tpu.vector_store %arg9[%c0_32, %c0_33], %49 {strides = array<i32>} : memref<8x1xf32, #tpu.memory_space<vmem>>, vector<8x1xf32>,
    } else {
    }
    %c0 = arith.constant 0 : index
    %c0_1 = arith.constant 0 : index
    %3 = vector.load %arg2[%c0, %c0_1] : memref<8x32xf32, #tpu.memory_space<vmem>>, vector<8x32xf32>
    %c0_2 = arith.constant 0 : index
    %c0_3 = arith.constant 0 : index
    %4 = vector.load %arg3[%c0_2, %c0_3] : memref<8x32xf32, #tpu.memory_space<vmem>>, vector<8x32xf32>
    %cst = arith.constant dense<0.000000e+00> : vector<8x8xf32>
    %5 = tpu.matmul %3, %4, %cst {dimension_numbers = #tpu.dot_dimension_numbers<[1], [1], [0], [0], [0, 0, 1, 0], [], []>} : vector<8x32xf32>, vector<8x32xf32>, vector<8x8xf32> -> vector<8x8xf32>
    %6 = arith.mulf %3, %3 : vector<8x32xf32>
    %cst_4 = arith.constant dense<0.000000e+00> : vector<8xf32>
    %7 = vector.multi_reduction <add>, %6, %cst_4 [1] : vector<8x32xf32> to vector<8xf32>
    %8 = vector.shape_cast %7 : vector<8xf32> to vector<8x1xf32>
    %c0_5 = arith.constant 0 : index
    %c0_6 = arith.constant 0 : index
    %9 = vector.load %arg4[%c0_5, %c0_6] : memref<1x8xf32, #tpu.memory_space<vmem>>, vector<1x8xf32>
    %10 = vector.broadcast %8 : vector<8x1xf32> to vector<8x8xf32>
    %11 = vector.broadcast %9 : vector<1x8xf32> to vector<8x8xf32>
    %12 = arith.addf %10, %11 : vector<8x8xf32>
    %cst_7 = arith.constant 2.000000e+00 : f32
    %13 = vector.broadcast %cst_7 : f32 to vector<8x8xf32>
    %14 = arith.mulf %13, %5 : vector<8x8xf32>
    %15 = arith.subf %12, %14 : vector<8x8xf32>
    %c0_8 = arith.constant 0 : index
    %c0_9 = arith.constant 0 : index
    %16 = vector.load %arg5[%c0_8, %c0_9] : memref<8x1xi32, #tpu.memory_space<vmem>>, vector<8x1xi32>
    %c0_10 = arith.constant 0 : index
    %c0_11 = arith.constant 0 : index
    %17 = vector.load %arg6[%c0_10, %c0_11] : memref<1x8xi32, #tpu.memory_space<vmem>>, vector<1x8xi32>
    %18 = vector.broadcast %16 : vector<8x1xi32> to vector<8x8xi32>
    %19 = vector.broadcast %17 : vector<1x8xi32> to vector<8x8xi32>
    %20 = arith.cmpi eq, %18, %19 : vector<8x8xi32>
    %c8_i32 = arith.constant 8 : i32
    %21 = arith.muli %arg1, %c8_i32 : i32
    %22 = tpu.iota {dimensions = array<i32: 1>} : vector<8x8xi32>
    %23 = vector.broadcast %21 : i32 to vector<8x8xi32>
    %24 = arith.addi %23, %22 : vector<8x8xi32>
    %c8_i32_12 = arith.constant 8 : i32
    %25 = vector.broadcast %c8_i32_12 : i32 to vector<8x8xi32>
    %26 = arith.cmpi slt, %24, %25 : vector<8x8xi32>
    %27 = arith.andi %20, %26 : vector<8x8xi1>
    %cst_13 = arith.constant dense<true> : vector<8x8xi1>
    %28 = arith.xori %20, %cst_13 : vector<8x8xi1>
    %29 = arith.andi %28, %26 : vector<8x8xi1>
    %c0_14 = arith.constant 0 : index
    %c0_15 = arith.constant 0 : index
    %30 = vector.load %arg8[%c0_14, %c0_15] : memref<8x1xf32, #tpu.memory_space<vmem>>, vector<8x1xf32>
    %cst_16 = arith.constant -3.000000e+38 : f32
    %31 = vector.broadcast %cst_16 : f32 to vector<8x8xf32>
    %32 = arith.select %27, %15, %31 : vector<8x8xi1>, vector<8x8xf32>
    %cst_17 = arith.constant dense<0xFF800000> : vector<8xf32>
    %33 = vector.multi_reduction <maximumf>, %32, %cst_17 [1] : vector<8x8xf32> to vector<8xf32>
    %34 = vector.shape_cast %33 : vector<8xf32> to vector<8x1xf32>
    %35 = arith.maximumf %30, %34 : vector<8x1xf32>
    %c0_18 = arith.constant 0 : index
    %c0_19 = arith.constant 0 : index
    %36 = vector.load %arg8[%c0_18, %c0_19] : memref<8x1xf32, #tpu.memory_space<vmem>>, vector<8x1xf32>
    tpu.vector_store %arg8[%c0_18, %c0_19], %35 {strides = array<i32>} : memref<8x1xf32, #tpu.memory_space<vmem>>, vector<8x1xf32>,
    %c0_20 = arith.constant 0 : index
    %c0_21 = arith.constant 0 : index
    %37 = vector.load %arg9[%c0_20, %c0_21] : memref<8x1xf32, #tpu.memory_space<vmem>>, vector<8x1xf32>
    %cst_22 = arith.constant 3.000000e+38 : f32
    %38 = vector.broadcast %cst_22 : f32 to vector<8x8xf32>
    %39 = arith.select %29, %15, %38 : vector<8x8xi1>, vector<8x8xf32>
    %cst_23 = arith.constant dense<0x7F800000> : vector<8xf32>
    %40 = vector.multi_reduction <minimumf>, %39, %cst_23 [1] : vector<8x8xf32> to vector<8xf32>
    %41 = vector.shape_cast %40 : vector<8xf32> to vector<8x1xf32>
    %42 = arith.minimumf %37, %41 : vector<8x1xf32>
    %c0_24 = arith.constant 0 : index
    %c0_25 = arith.constant 0 : index
    %43 = vector.load %arg9[%c0_24, %c0_25] : memref<8x1xf32, #tpu.memory_space<vmem>>, vector<8x1xf32>
    tpu.vector_store %arg9[%c0_24, %c0_25], %42 {strides = array<i32>} : memref<8x1xf32, #tpu.memory_space<vmem>>, vector<8x1xf32>,
    %c0_i32_26 = arith.constant 0 : i32
    %44 = arith.cmpi eq, %arg1, %c0_i32_26 : i32
    %45 = arith.extui %44 : i1 to i32
    %c0_i32_27 = arith.constant 0 : i32
    %46 = arith.cmpi ne, %45, %c0_i32_27 : i32
    scf.if %46 {
      %c0_28 = arith.constant 0 : index
      %c0_29 = arith.constant 0 : index
      %47 = vector.load %arg8[%c0_28, %c0_29] : memref<8x1xf32, #tpu.memory_space<vmem>>, vector<8x1xf32>
      %cst_30 = arith.constant 9.99999996E-13 : f32
      %48 = vector.broadcast %cst_30 : f32 to vector<8x1xf32>
      %49 = arith.maximumf %47, %48 : vector<8x1xf32>
      %50 = math.sqrt %49 : vector<8x1xf32>
      %c0_31 = arith.constant 0 : index
      %c0_32 = arith.constant 0 : index
      %51 = vector.load %arg9[%c0_31, %c0_32] : memref<8x1xf32, #tpu.memory_space<vmem>>, vector<8x1xf32>
      %cst_33 = arith.constant 9.99999996E-13 : f32
      %52 = vector.broadcast %cst_33 : f32 to vector<8x1xf32>
      %53 = arith.maximumf %51, %52 : vector<8x1xf32>
      %54 = math.sqrt %53 : vector<8x1xf32>
      %55 = arith.subf %50, %54 : vector<8x1xf32>
      %cst_34 = arith.constant 3.000000e-01 : f32
      %56 = vector.broadcast %cst_34 : f32 to vector<8x1xf32>
      %57 = arith.addf %55, %56 : vector<8x1xf32>
      %cst_35 = arith.constant 0.000000e+00 : f32
      %58 = vector.broadcast %cst_35 : f32 to vector<8x1xf32>
      %59 = arith.maximumf %57, %58 : vector<8x1xf32>
      %c0_36 = arith.constant 0 : index
      %c0_37 = arith.constant 0 : index
      %60 = vector.load %arg7[%c0_36, %c0_37] : memref<8x1xf32, #tpu.memory_space<vmem>>, vector<8x1xf32>
      tpu.vector_store %arg7[%c0_36, %c0_37], %59 {strides = array<i32>} : memref<8x1xf32, #tpu.memory_space<vmem>>, vector<8x1xf32>,
    } else {
    }
    return
  }
  func.func @transform_0(%arg0: i32, %arg1: i32) -> (i32, i32) {
    %c0_i32 = arith.constant 0 : i32
    %c0_i32_0 = arith.constant 0 : i32
    return %arg0, %c0_i32 : i32, i32
  }
  func.func @transform_1(%arg0: i32, %arg1: i32) -> (i32, i32) {
    %c0_i32 = arith.constant 0 : i32
    %c0_i32_0 = arith.constant 0 : i32
    return %arg1, %c0_i32 : i32, i32
  }
  func.func @transform_2(%arg0: i32, %arg1: i32) -> (i32, i32) {
    %c0_i32 = arith.constant 0 : i32
    %c0_i32_0 = arith.constant 0 : i32
    return %c0_i32, %arg1 : i32, i32
  }
  func.func @transform_3(%arg0: i32, %arg1: i32) -> (i32, i32) {
    %c0_i32 = arith.constant 0 : i32
    %c0_i32_0 = arith.constant 0 : i32
    return %arg0, %c0_i32 : i32, i32
  }
  func.func @transform_4(%arg0: i32, %arg1: i32) -> (i32, i32) {
    %c0_i32 = arith.constant 0 : i32
    %c0_i32_0 = arith.constant 0 : i32
    return %c0_i32, %arg1 : i32, i32
  }
  func.func @transform_5(%arg0: i32, %arg1: i32) -> (i32, i32) {
    %c0_i32 = arith.constant 0 : i32
    %c0_i32_0 = arith.constant 0 : i32
    return %arg0, %c0_i32 : i32, i32
  }
}

</mosaic_0001>

<bundles_post_ra>
// kernel: tpu_custom_call.1
= control target key start
LH: loop header
LB: loop body
LE: loop exit
PB: predicated region body
PF: predicated region fallthrough
CT: control target
= control target key end

     0   :  { %10 = vsyncpa [#allocation5], 0  ;;  %s242_s18 = smov [#allocation4]   ;;  %s302_s0 = inlined_call_operand.vmem [shape: f32[8,32], index: 0, kind: input, shape index: {}]   ;;  %s303_s1 = inlined_call_operand.hbm [shape: f32[8,32], index: 1, kind: input, shape index: {}]   ;;  %s304_s2 = inlined_call_operand.vmem [shape: f32[1,8], index: 2, kind: input, shape index: {}]   ;;  %s305_s3 = inlined_call_operand.vmem [shape: s32[8,1], index: 3, kind: input, shape index: {}]   ;;  %s306_s4 = inlined_call_operand.vmem [shape: s32[1,8], index: 4, kind: input, shape index: {}]   ;;  %s307_s5 = inlined_call_operand.vmem [shape: f32[8,1], index: 5, kind: output, shape index: {}]  }
   0x1   :  { %s19_s19 = sshll.u32 %s242_s18, 4  ;;  %s20_s19 = int_to_ptr.vmem [resolvable:$true] %s19_s19 }
   0x2   :  { %s228_s20 = scalar_lea.vmem %s20_s19, 128  ;;  %p233_p1 = scmp.lt.s32.totalorder %s20_s19, %s20_s19 }
   0x3   :  { %p229_p0 = scmp.ne.s32.totalorder %s20_s19, %s228_s20  ;;  %p234_p2 = scmp.lt.s32.totalorder %s228_s20, %s228_s20 }
   0x5   :  { %p235_p3 = por %p234_p2, %p233_p1 }
   0x7   :  { %p236_p4 = pnand %p235_p3, %p229_p0 }
   0x9   :  { %239 = shalt.err (!%p236_p4)
}
   0xa   :  { %22 = dma.hbm_to_vmem [thread:$0]  %s303_s1, 128, %s20_s19, [#allocation5]  }
   0xb   :  { %240 = dma.done.wait [#allocation5], 128  }
   0xc   :  { %241 = vsyncadd [#allocation5], 4294967168  ;;  %v243_v0 = vmov 0.0   ;;  %vm244_vm0 = vmmov 0   ;;  %v245_v1 = vmov 0   ;;  %vm41_vm1 = vcmask 261120  }
   0xd   :  { %203 = vmatprep.subr.mxu0 %v243_v0  ;;  %205 = vmatprep.mubr.msk.f32.mxu0 %vm244_vm0, %v243_v0  ;;  %v40_v2 = vld [vmem:[#allocation4] sm:$0xff]  ;;  %v39_v3 = vld [vmem:[%s302_s0] sm:$0xff]  ;;  %vm36_vm2 = vcmask 7168   ;;  %v246_v7 = vmov -3e+38   ;;  %v143_v9 = vlaneseq  ;;  %vm247_vm5 = vmmov 1  }
   0xe   :  { %215 = vset.pattern.permute.xlu0 %v245_v1  ;;  %204 = vmatpush3.xpose.msk.msra.mxu0 %vm41_vm1, %v40_v2  ;;  %v118_v4 = vmul.f32 %v39_v3, %v39_v3  ;;  %v132_v6 = vld [vmem:[%s305_s3] sm:$0xff]  ;;  %37 = vst.msk [vmem:[#allocation2] sm:$0xff] %vm36_vm2, %v246_v7  ;;  %vm153_vm8 = vcmask 64512   ;;  %v248_v23 = vmov 3e+38  }
   0xf   :  { %v200_v10 = vld [vmem:[%s306_s4] ss:$0 sm:$0xff]  ;;  %v144_v11 = vand.u32 127, %v143_v9  ;;  %38 = vst.msk [vmem:[#allocation3] sm:$0xff] %vm36_vm2, %v248_v23 }
  0x10   :  { %v119_v5 = vsel %vm41_vm1, %v118_v4, 0.0  ;;  %v199_v13 = vld [vmem:[%s304_s2] ss:$0 sm:$0xff] }
  0x11   :  { %206 = vmatmul.mubr.msk.f32.vlgmr.msra.gmra.mxu0 %vm41_vm1, %v39_v3  ;;  %120 = vadd.xlane.f32.xlu0 %v119_v5  ;;  %vm147_vm4 = vcmp.lt.s32.totalorder %v144_v11, 8 }
  0x15   :  { %v151_v24 = vld [vmem:[#allocation2] sm:$0xff] }
  0x16   :  { %v160_v27 = vld [vmem:[#allocation3] sm:$0xff] }
  0x27   :  { %135 = vperm.xlu0 %215, %v132_v6  }
  0x9a   :  { %v121_v8 = vpop.xlane.xlu0 %120 }
  0x9b   :  { %v129_v15 = vadd.f32 %v199_v13, %v121_v8 }
  0xa2   :  { %v136_v12 = vpop.permute.xlu0 %135 }
  0xa3   :  { %vm141_vm3 = vcmp.eq.s32.totalorder %v136_v12, %v200_v10 }
  0xa4   :  { %vm149_vm6 = vmxor %vm141_vm3, %vm247_vm5 }
  0xa5   :  { %vm148_vm7 = vmand %vm141_vm3, %vm147_vm4 }
  0xa6   :  { %vm150_vm9 = vmand %vm149_vm6, %vm147_vm4 }
  0xd1   :  { %v114_v14 = vpop.f32.mrf.mxu0 }
  0xd2   :  { %v130_v16 = vmul.f32 2.0, %v114_v14 }
  0xd3   :  { %v207_v17 = vpop.f32.mrf.mxu0 }
  0xd4   :  { %v131_v18 = vsub.f32 %v129_v15, %v130_v16 }
  0xd6   :  { %v152_v19 = vsel %vm148_vm7, %v131_v18, -3e+38  ;;  %v161_v21 = vsel %vm150_vm9, %v131_v18, 3e+38 }
  0xd7   :  { %v154_v20 = vsel %vm153_vm8, %v152_v19, -inf  ;;  %v162_v22 = vsel %vm153_vm8, %v161_v21, inf }
  0xd8   :  { %155 = vmax.xlane.f32.xlu1 %v154_v20 }
  0xdc   :  { %163 = vmin.xlane.f32.xlu1 %v162_v22 }
 0x161   :  { %v156_v25 = vpop.xlane.xlu1 %155 }
 0x162   :  { %v157_v26 = vmax.f32 %v151_v24, %v156_v25 }
 0x164   :  { %159 = vst.msk [vmem:[#allocation2] sm:$0xff] %vm36_vm2, %v157_v26 }
 0x165   :  { %v164_v28 = vpop.xlane.xlu1 %163 }
 0x166   :  { %v165_v29 = vmin.f32 %v160_v27, %v164_v28 }
 0x168   :  { %166 = vst.msk [vmem:[#allocation3] sm:$0xff] %vm36_vm2, %v165_v29 }
 0x16b   :  { %v170_v30 = vld [vmem:[#allocation2] sm:$0xff] }
 0x16c   :  { %v171_v31 = vmax.f32 %v170_v30, 1e-12 }
 0x16e   :  { %216 = vrsqrt.f32 %v171_v31  ;;  %vm174_vm10 = vcmp.eq.f32.partialorder %v171_v31, inf  ;;  %v177_v39 = vand.u32 2147483648, %v171_v31  ;;  %vm176_vm12 = vcmp.eq.f32.partialorder %v171_v31, 0.0 }
 0x16f   :  { %v179_v32 = vld [vmem:[#allocation3] sm:$0xff] }
 0x170   :  { %v180_v33 = vmax.f32 %v179_v32, 1e-12 }
 0x172   :  { %218 = vrsqrt.f32 %v180_v33  ;;  %vm183_vm11 = vcmp.eq.f32.partialorder %v180_v33, inf  ;;  %v186_v40 = vand.u32 2147483648, %v180_v33  ;;  %vm185_vm13 = vcmp.eq.f32.partialorder %v180_v33, 0.0 }
 0x17b   :  { %v217_v34 = vpop.eup %216 }
 0x17c   :  { %v173_v35 = vmul.f32 %v217_v34, %v171_v31 }
 0x17e   :  { %v175_v37 = vsel %vm174_vm10, %v171_v31, %v173_v35 }
 0x17f   :  { %v219_v36 = vpop.eup %218  ;;  %v178_v42 = vsel %vm176_vm12, %v177_v39, %v175_v37 }
 0x180   :  { %v182_v38 = vmul.f32 %v219_v36, %v180_v33 }
 0x182   :  { %v184_v41 = vsel %vm183_vm11, %v180_v33, %v182_v38 }
 0x183   :  { %v187_v43 = vsel %vm185_vm13, %v186_v40, %v184_v41 }
 0x184   :  { %v188_v44 = vsub.f32 %v178_v42, %v187_v43 }
 0x186   :  { %v189_v45 = vadd.f32 0.3, %v188_v44 }
 0x188   :  { %v190_v46 = vmax.f32 %v189_v45, 0.0 }
 0x18a   :  { %191 = vst.msk [vmem:[%s307_s5] sm:$0xff] %vm36_vm2, %v190_v46 }
 0x18b   :  { %196 = vsyncpa [#allocation5], 1 }

</bundles_post_ra>
